<compile_context>
chip_gen: v6e
topology: v6e:2x2x1
jax: 0.10.0
libtpu: 0.0.40
codegen_flags: <defaults>
</compile_context>

<pallas_src>
import numpy as np
import jax
import jax.numpy as jnp
from jax.experimental import pallas as pl
from jax.experimental.pallas import tpu as pltpu

# ----- small config consistent with the module's __init__ -----
B = 2              # batch
N = 16             # input_size (sequence length)
C = 32             # channels
NHEAD = 4
HD = C // NHEAD    # head_dim = channels // nhead (dim_d=None)
NC = NHEAD * HD    # concat-head width (== C)
DIM_K = 8          # linformer low-rank projection dim
FF = 64            # dim_ff
LN_EPS = 1e-5      # PyTorch nn.LayerNorm default eps
BN = B * N         # rows processed by the single program
HK = NHEAD * DIM_K # per-batch packed score width
BHK = B * HK       # all-batch packed score width
PROW = 128         # slab lane width (one lane tile)

# ----- single parameter slab layout (rows x 128 lanes, f32) -----
_SLAB_SECTION_SPECS = (
    ("w_all_t", C, 3 * NC),    # fused QKV weight, pre-transposed (C, 3*NC)
    ("ew_r", BHK, BN),         # block-diag-over-batch E/F weight, head-replicated
    ("maskk", NC, BHK),        # head mask for K (scaled by 1/sqrt(HD))
    ("kbias", NC, BHK),        # masked E-bias for K (scaled by 1/sqrt(HD))
    ("maskv", BHK, NC),        # head mask for V
    ("vbias", BHK, NC),        # masked E-bias for V
    ("segsum", BHK, BHK),      # block-diag ones: segmented softmax denominators
    ("pmask", BN, BHK),        # batch mask applied to softmax probabilities
    ("wo_t", NC, C),           # w_o, pre-transposed
    ("w1_t", C, FF),           # ff w1, pre-transposed
    ("w2_t", FF, C),           # ff w2, pre-transposed
    ("small", 8, PROW),        # tiny bias / scale row-vectors
)
_SLAB_LAYOUT = {}
_off = 0
for _name, _nr, _nc in _SLAB_SECTION_SPECS:
    _SLAB_LAYOUT[_name] = (_off, _nr, _nc)
    _off += _nr
SLAB_ROWS = _off  # 520 rows, 8-aligned section starts, lane offset 0 everywhere

_SMALL_ROWS = {"bo": (0, C), "g1": (1, C), "be1": (2, C), "b1": (3, FF),
               "b2": (4, C), "g2": (5, C), "be2": (6, C)}


def _sec(slab_ref, name):
    off, rows, cols = _SLAB_LAYOUT[name]
    return slab_ref[off:off + rows, 0:cols]


def _row(slab_ref, name):
    r, w = _SMALL_ROWS[name]
    off = _SLAB_LAYOUT["small"][0] + r
    return slab_ref[off:off + 1, 0:w]


def _gelu_exact(x):
    # PyTorch F.gelu default == exact erf-based gelu
    return 0.5 * x * (1.0 + jax.lax.erf(x / jnp.sqrt(jnp.float32(2.0))))


def linformer_kernel(x_ref, slab_ref, o_ref):
    f32 = jnp.float32
    x = x_ref[...]                                                  # (BN, C)

    # ---- fused QKV projection: one (BN, C) x (C, 3*NC) MXU pass ----
    qkv = jax.lax.dot_general(x, _sec(slab_ref, "w_all_t"),
                              (((1,), (0,)), ((), ())),
                              preferred_element_type=f32)           # (BN, 3*NC)
    q = qkv[:, 0:NC]
    k = qkv[:, NC:2 * NC]
    v = qkv[:, 2 * NC:3 * NC]

    ew_r = _sec(slab_ref, "ew_r")                                   # (BHK, BN)

    # ---- E/F low-rank projections for ALL batches & heads (2 matmuls) ----
    # (the E projection contracts the sequence dim, which lives on K/V rows,
    #  so the LHS of this dot is necessarily "transposed")
    ktile = jax.lax.dot_general(k, ew_r, (((0,), (1,)), ((), ())),
                                preferred_element_type=f32)         # (NC, BHK)
    kbd = ktile * _sec(slab_ref, "maskk") + _sec(slab_ref, "kbias") # head-masked,
                                                                    # 1/sqrt(HD) folded in
    vtile = jax.lax.dot_general(ew_r, v, (((1,), (0,)), ((), ())),
                                preferred_element_type=f32)         # (BHK, NC)
    vbd = vtile * _sec(slab_ref, "maskv") + _sec(slab_ref, "vbias")

    # ---- scores for every (batch, head) block in ONE matmul ----
    s = jax.lax.dot_general(q, kbd, (((1,), (0,)), ((), ())),
                            preferred_element_type=f32)             # (BN, BHK)

    # ---- segmented softmax over each DIM_K-wide head block ----
    m = jnp.max(s, axis=-1, keepdims=True)          # per-row shift (softmax-invariant)
    e = jnp.exp(s - m)
    denom = jax.lax.dot_general(e, _sec(slab_ref, "segsum"),
                                (((1,), (0,)), ((), ())),
                                preferred_element_type=f32)         # per-block sums
    denom = jnp.maximum(denom, jnp.float32(1e-30))  # guard the unused cross-batch blocks
    p = e * pl.reciprocal(denom, approx=True)
    p = p * _sec(slab_ref, "pmask")                 # zero cross-batch blocks

    # ---- concat(heads) directly from ONE context matmul (no VMEM scratch) ----
    heads = jax.lax.dot_general(p, vbd, (((1,), (0,)), ((), ())),
                                preferred_element_type=f32)         # (BN, NC)

    # ---- output projection ----
    attn = jax.lax.dot_general(heads, _sec(slab_ref, "wo_t"),
                               (((1,), (0,)), ((), ())),
                               preferred_element_type=f32) + _row(slab_ref, "bo")

    # ---- residual + LayerNorm (post-norm) ----
    y = x + attn
    mu = jnp.mean(y, axis=-1, keepdims=True)
    var = jnp.mean((y - mu) ** 2, axis=-1, keepdims=True)
    y = (y - mu) * jax.lax.rsqrt(var + LN_EPS) * _row(slab_ref, "g1") \
        + _row(slab_ref, "be1")

    # ---- FeedForward (exact-erf gelu) ----
    h1 = jax.lax.dot_general(y, _sec(slab_ref, "w1_t"), (((1,), (0,)), ((), ())),
                             preferred_element_type=f32) + _row(slab_ref, "b1")
    h1 = _gelu_exact(h1)
    h2 = jax.lax.dot_general(h1, _sec(slab_ref, "w2_t"), (((1,), (0,)), ((), ())),
                             preferred_element_type=f32) + _row(slab_ref, "b2")

    # ---- residual + LayerNorm (post-norm) ----
    z = y + h2
    mu2 = jnp.mean(z, axis=-1, keepdims=True)
    var2 = jnp.mean((z - mu2) ** 2, axis=-1, keepdims=True)
    o_ref[...] = (z - mu2) * jax.lax.rsqrt(var2 + LN_EPS) * _row(slab_ref, "g2") \
        + _row(slab_ref, "be2")


def build_slab(params):
    """Pack every constant operand into one (SLAB_ROWS, 128) f32 slab."""
    wq, wk, wv, ew, eb, wo, bo, g1, be1, w1, b1, w2, b2, g2, be2 = params
    f32 = jnp.float32
    inv = jnp.float32(1.0 / np.sqrt(HD))

    # fused, pre-transposed QKV weight (C, 3*NC)
    w_all_t = jnp.concatenate([wq.reshape(NC, C), wk.reshape(NC, C),
                               wv.reshape(NC, C)], axis=0).T.astype(f32)

    # block-diagonal-over-batch E/F weight, replicated once per head down rows:
    # ew_r[(b*NHEAD+h)*DIM_K + k, b'*N + n] = ew[k, n] * (b == b')
    ew_r = jnp.kron(jnp.eye(B, dtype=f32), jnp.tile(ew.astype(f32), (NHEAD, 1)))

    # head masks / masked E-biases
    row_head = jnp.arange(NC) // HD                       # (NC,)
    col_head = (jnp.arange(BHK) % HK) // DIM_K            # (BHK,)
    headmask = (row_head[:, None] == col_head[None, :]).astype(f32)   # (NC, BHK)
    eb_row = jnp.tile(eb.reshape(1, DIM_K).astype(f32), (1, B * NHEAD))  # (1, BHK)
    eb_col = jnp.tile(eb.reshape(DIM_K, 1).astype(f32), (B * NHEAD, 1))  # (BHK, 1)

    maskk = headmask * inv                                # 1/sqrt(HD) folded in
    kbias = headmask * eb_row * inv
    maskv = headmask.T                                    # (BHK, NC)
    vbias = maskv * eb_col

    # segmented-softmax denominator weight and batch mask for probabilities
    segsum = jnp.kron(jnp.eye(B * NHEAD, dtype=f32), jnp.ones((DIM_K, DIM_K), f32))
    pmask = jnp.kron(jnp.eye(B, dtype=f32), jnp.ones((N, HK), f32))

    # tiny bias / scale rows
    small = jnp.zeros((8, PROW), f32)
    def setrow(buf, name, vec):
        r, w = _SMALL_ROWS[name]
        vec = jnp.ravel(vec).astype(f32)
        assert vec.shape[0] == w
        return buf.at[r, 0:w].set(vec)
    small = setrow(small, "bo", bo)
    small = setrow(small, "g1", g1)
    small = setrow(small, "be1", be1)
    small = setrow(small, "b1", b1)
    small = setrow(small, "b2", b2)
    small = setrow(small, "g2", g2)
    small = setrow(small, "be2", be2)

    sections = {"w_all_t": w_all_t, "ew_r": ew_r, "maskk": maskk, "kbias": kbias,
                "maskv": maskv, "vbias": vbias, "segsum": segsum, "pmask": pmask,
                "wo_t": wo.T.astype(f32), "w1_t": w1.T.astype(f32),
                "w2_t": w2.T.astype(f32), "small": small}

    padded = []
    for name, nr, ncol in _SLAB_SECTION_SPECS:
        a = sections[name]
        assert a.shape == (nr, ncol), (name, a.shape, (nr, ncol))
        padded.append(jnp.pad(a, ((0, 0), (0, PROW - ncol))))
    slab = jnp.concatenate(padded, axis=0)
    assert slab.shape == (SLAB_ROWS, PROW)
    return slab


def _full_spec(shape):
    return pl.BlockSpec(shape, lambda i: (0,) * len(shape))


def linformer_forward(x, params):
    f32 = jnp.float32
    slab = build_slab(params)
    x2d = x.reshape(BN, C).astype(f32)

    out2d = pl.pallas_call(
        linformer_kernel,
        out_shape=jax.ShapeDtypeStruct((BN, C), f32),
        grid=(1,),
        in_specs=[
            _full_spec((BN, C)),             # x (whole batch, one block)
            _full_spec((SLAB_ROWS, PROW)),   # packed weights/masks/biases slab
        ],
        out_specs=_full_spec((BN, C)),
        compiler_params=pltpu.CompilerParams(
            dimension_semantics=("arbitrary",)),
    )(x2d, slab)
    return out2d.reshape(B, N, C)


# ---------------- pure-JAX reference (mirrors the PyTorch forward) ----------------
def _layernorm(x, g, b):
    mu = jnp.mean(x, axis=-1, keepdims=True)
    var = jnp.mean((x - mu) ** 2, axis=-1, keepdims=True)
    return (x - mu) * jax.lax.rsqrt(var + LN_EPS) * g + b


def linformer_ref(x, params):
    wq, wk, wv, ew, eb, wo, bo, g1, be1, w1, b1, w2, b2, g2, be2 = params
    heads = []
    for h in range(NHEAD):
        Q = x @ wq[h].T                      # (B, N, HD)
        K = x @ wk[h].T
        V = x @ wv[h].T
        Kt = jnp.swapaxes(K, 1, 2)           # (B, HD, N)
        Kp = Kt @ ew.T + eb                  # (B, HD, DIM_K)
        S = (Q @ Kp) / jnp.sqrt(jnp.float32(HD))
        P = jax.nn.softmax(S, axis=-1)
        Vt = jnp.swapaxes(V, 1, 2)
        Vp = Vt @ ew.T + eb                  # (B, HD, DIM_K)
        Vp = jnp.swapaxes(Vp, 1, 2)          # (B, DIM_K, HD)
        heads.append(P @ Vp)                 # (B, N, HD)
    out = jnp.concatenate(heads, axis=-1) @ wo.T + bo
    y = _layernorm(x + out, g1, be1)
    h1 = _gelu_exact(y @ w1.T + b1)
    h2 = h1 @ w2.T + b2
    return _layernorm(y + h2, g2, be2)


def make_params(key):
    ks = jax.random.split(key, 16)
    f = jnp.float32
    wq = (jax.random.normal(ks[0], (NHEAD, HD, C), f) * (1.0 / np.sqrt(C)))
    wk = (jax.random.normal(ks[1], (NHEAD, HD, C), f) * (1.0 / np.sqrt(C)))
    wv = (jax.random.normal(ks[2], (NHEAD, HD, C), f) * (1.0 / np.sqrt(C)))
    # E projection: xavier-normal-ish weight + small bias (nn.Linear(input_size, dim_k))
    ew = jax.random.normal(ks[3], (DIM_K, N), f) * np.sqrt(2.0 / (N + DIM_K))
    eb = jax.random.normal(ks[4], (1, DIM_K), f) * 0.02
    wo = jax.random.normal(ks[5], (C, C), f) * (1.0 / np.sqrt(C))
    bo = jax.random.normal(ks[6], (1, C), f) * 0.02
    g1 = 1.0 + 0.1 * jax.random.normal(ks[7], (1, C), f)
    be1 = 0.1 * jax.random.normal(ks[8], (1, C), f)
    w1 = jax.random.normal(ks[9], (FF, C), f) * (1.0 / np.sqrt(C))
    b1 = jax.random.normal(ks[10], (1, FF), f) * 0.02
    w2 = jax.random.normal(ks[11], (C, FF), f) * (1.0 / np.sqrt(FF))
    b2 = jax.random.normal(ks[12], (1, C), f) * 0.02
    g2 = 1.0 + 0.1 * jax.random.normal(ks[13], (1, C), f)
    be2 = 0.1 * jax.random.normal(ks[14], (1, C), f)
    return (wq, wk, wv, ew, eb, wo, bo, g1, be1, w1, b1, w2, b2, g2, be2)


if __name__ == "__main__":
    key = jax.random.PRNGKey(0)
    kx, kp = jax.random.split(key)
    x = jax.random.normal(kx, (B, N, C), jnp.float32)
    params = make_params(kp)

    out = linformer_forward(x, params)
    out = jax.block_until_ready(out)

    ref = jax.block_until_ready(linformer_ref(x, params))
    assert out.shape == (B, N, C)
    assert np.allclose(np.asarray(out), np.asarray(ref), atol=5e-3, rtol=5e-3), (
        "Pallas kernel output does not match reference")
    print("KERNEL_OK")
</pallas_src>

<mosaic_0001>
module attributes {stable_mosaic.version = 11 : i64} {
  func.func @linformer_kernel(%arg0: i32, %arg1: memref<32x32xf32, #tpu.memory_space<vmem>>, %arg2: memref<520x128xf32, #tpu.memory_space<vmem>>, %arg3: memref<32x32xf32, #tpu.memory_space<vmem>>) attributes {dimension_semantics = [#tpu.dimension_semantics<arbitrary>], iteration_bounds = array<i64: 1>, scalar_prefetch = 0 : i64, scratch_operands = 0 : i64, tpu.core_type = #tpu.core_type<tc>, window_params = [{pipeline_mode = #tpu.pipeline_mode<synchronous>, transform_indices = @transform_0, window_bounds = array<i64: 32, 32>}, {pipeline_mode = #tpu.pipeline_mode<synchronous>, transform_indices = @transform_1, window_bounds = array<i64: 520, 128>}, {pipeline_mode = #tpu.pipeline_mode<synchronous>, transform_indices = @transform_2, window_bounds = array<i64: 32, 32>}]} {
    %c0 = arith.constant 0 : index
    %c0_0 = arith.constant 0 : index
    %0 = vector.load %arg1[%c0, %c0_0] : memref<32x32xf32, #tpu.memory_space<vmem>>, vector<32x32xf32>
    %c0_1 = arith.constant 0 : index
    %c0_2 = arith.constant 0 : index
    %1 = vector.load %arg2[%c0_1, %c0_2] : memref<520x128xf32, #tpu.memory_space<vmem>>, vector<32x96xf32>
    %cst = arith.constant dense<0.000000e+00> : vector<32x96xf32>
    %2 = tpu.matmul %0, %1, %cst {dimension_numbers = #tpu.dot_dimension_numbers<[1], [0], [0], [1], [0, 0, 1, 1], [], []>} : vector<32x32xf32>, vector<32x96xf32>, vector<32x96xf32> -> vector<32x96xf32>
    %3 = vector.extract_strided_slice %2 {offsets = [0, 0], sizes = [32, 32], strides = [1, 1]} : vector<32x96xf32> to vector<32x32xf32>
    %4 = vector.extract_strided_slice %2 {offsets = [0, 32], sizes = [32, 32], strides = [1, 1]} : vector<32x96xf32> to vector<32x32xf32>
    %5 = vector.extract_strided_slice %2 {offsets = [0, 64], sizes = [32, 32], strides = [1, 1]} : vector<32x96xf32> to vector<32x32xf32>
    %c32 = arith.constant 32 : index
    %c0_3 = arith.constant 0 : index
    %6 = vector.load %arg2[%c32, %c0_3] : memref<520x128xf32, #tpu.memory_space<vmem>>, vector<64x32xf32>
    %cst_4 = arith.constant dense<0.000000e+00> : vector<32x64xf32>
    %7 = tpu.matmul %4, %6, %cst_4 {dimension_numbers = #tpu.dot_dimension_numbers<[0], [1], [1], [0], [0, 1, 1, 0], [], []>} : vector<32x32xf32>, vector<64x32xf32>, vector<32x64xf32> -> vector<32x64xf32>
    %c96 = arith.constant 96 : index
    %c0_5 = arith.constant 0 : index
    %8 = vector.load %arg2[%c96, %c0_5] : memref<520x128xf32, #tpu.memory_space<vmem>>, vector<32x64xf32>
    %9 = arith.mulf %7, %8 : vector<32x64xf32>
    %c128 = arith.constant 128 : index
    %c0_6 = arith.constant 0 : index
    %10 = vector.load %arg2[%c128, %c0_6] : memref<520x128xf32, #tpu.memory_space<vmem>>, vector<32x64xf32>
    %11 = arith.addf %9, %10 : vector<32x64xf32>
    %cst_7 = arith.constant dense<0.000000e+00> : vector<64x32xf32>
    %12 = tpu.matmul %6, %5, %cst_7 {dimension_numbers = #tpu.dot_dimension_numbers<[1], [0], [0], [1], [0, 0, 1, 1], [], []>} : vector<64x32xf32>, vector<32x32xf32>, vector<64x32xf32> -> vector<64x32xf32>
    %c160 = arith.constant 160 : index
    %c0_8 = arith.constant 0 : index
    %13 = vector.load %arg2[%c160, %c0_8] : memref<520x128xf32, #tpu.memory_space<vmem>>, vector<64x32xf32>
    %14 = arith.mulf %12, %13 : vector<64x32xf32>
    %c224 = arith.constant 224 : index
    %c0_9 = arith.constant 0 : index
    %15 = vector.load %arg2[%c224, %c0_9] : memref<520x128xf32, #tpu.memory_space<vmem>>, vector<64x32xf32>
    %16 = arith.addf %14, %15 : vector<64x32xf32>
    %cst_10 = arith.constant dense<0.000000e+00> : vector<32x64xf32>
    %17 = tpu.matmul %3, %11, %cst_10 {dimension_numbers = #tpu.dot_dimension_numbers<[1], [0], [0], [1], [0, 0, 1, 1], [], []>} : vector<32x32xf32>, vector<32x64xf32>, vector<32x64xf32> -> vector<32x64xf32>
    %cst_11 = arith.constant dense<0xFF800000> : vector<32xf32>
    %18 = vector.multi_reduction <maximumf>, %17, %cst_11 [1] : vector<32x64xf32> to vector<32xf32>
    %19 = vector.shape_cast %18 : vector<32xf32> to vector<32x1xf32>
    %20 = vector.broadcast %19 : vector<32x1xf32> to vector<32x64xf32>
    %21 = arith.subf %17, %20 : vector<32x64xf32>
    %22 = math.exp %21 : vector<32x64xf32>
    %c288 = arith.constant 288 : index
    %c0_12 = arith.constant 0 : index
    %23 = vector.load %arg2[%c288, %c0_12] : memref<520x128xf32, #tpu.memory_space<vmem>>, vector<64x64xf32>
    %cst_13 = arith.constant dense<0.000000e+00> : vector<32x64xf32>
    %24 = tpu.matmul %22, %23, %cst_13 {dimension_numbers = #tpu.dot_dimension_numbers<[1], [0], [0], [1], [0, 0, 1, 1], [], []>} : vector<32x64xf32>, vector<64x64xf32>, vector<32x64xf32> -> vector<32x64xf32>
    %cst_14 = arith.constant 1.000000e-30 : f32
    %25 = vector.broadcast %cst_14 : f32 to vector<32x64xf32>
    %26 = arith.maximumf %24, %25 : vector<32x64xf32>
    %27 = tpu.reciprocal %26 {approx = true} : vector<32x64xf32> -> vector<32x64xf32>
    %28 = arith.mulf %22, %27 : vector<32x64xf32>
    %c352 = arith.constant 352 : index
    %c0_15 = arith.constant 0 : index
    %29 = vector.load %arg2[%c352, %c0_15] : memref<520x128xf32, #tpu.memory_space<vmem>>, vector<32x64xf32>
    %30 = arith.mulf %28, %29 : vector<32x64xf32>
    %cst_16 = arith.constant dense<0.000000e+00> : vector<32x32xf32>
    %31 = tpu.matmul %30, %16, %cst_16 {dimension_numbers = #tpu.dot_dimension_numbers<[1], [0], [0], [1], [0, 0, 1, 1], [], []>} : vector<32x64xf32>, vector<64x32xf32>, vector<32x32xf32> -> vector<32x32xf32>
    %c384 = arith.constant 384 : index
    %c0_17 = arith.constant 0 : index
    %32 = vector.load %arg2[%c384, %c0_17] : memref<520x128xf32, #tpu.memory_space<vmem>>, vector<32x32xf32>
    %cst_18 = arith.constant dense<0.000000e+00> : vector<32x32xf32>
    %33 = tpu.matmul %31, %32, %cst_18 {dimension_numbers = #tpu.dot_dimension_numbers<[1], [0], [0], [1], [0, 0, 1, 1], [], []>} : vector<32x32xf32>, vector<32x32xf32>, vector<32x32xf32> -> vector<32x32xf32>
    %c512 = arith.constant 512 : index
    %c0_19 = arith.constant 0 : index
    %34 = vector.load %arg2[%c512, %c0_19] : memref<520x128xf32, #tpu.memory_space<vmem>>, vector<1x32xf32>
    %35 = vector.broadcast %34 : vector<1x32xf32> to vector<32x32xf32>
    %36 = arith.addf %33, %35 : vector<32x32xf32>
    %37 = arith.addf %0, %36 : vector<32x32xf32>
    %cst_20 = arith.constant dense<0.000000e+00> : vector<32xf32>
    %38 = vector.multi_reduction <add>, %37, %cst_20 [1] : vector<32x32xf32> to vector<32xf32>
    %39 = vector.shape_cast %38 : vector<32xf32> to vector<32x1xf32>
    %cst_21 = arith.constant 3.200000e+01 : f32
    %40 = vector.broadcast %cst_21 : f32 to vector<32x1xf32>
    %41 = arith.divf %39, %40 : vector<32x1xf32>
    %42 = vector.broadcast %41 : vector<32x1xf32> to vector<32x32xf32>
    %43 = arith.subf %37, %42 : vector<32x32xf32>
    %44 = arith.mulf %43, %43 : vector<32x32xf32>
    %cst_22 = arith.constant dense<0.000000e+00> : vector<32xf32>
    %45 = vector.multi_reduction <add>, %44, %cst_22 [1] : vector<32x32xf32> to vector<32xf32>
    %46 = vector.shape_cast %45 : vector<32xf32> to vector<32x1xf32>
    %cst_23 = arith.constant 3.200000e+01 : f32
    %47 = vector.broadcast %cst_23 : f32 to vector<32x1xf32>
    %48 = arith.divf %46, %47 : vector<32x1xf32>
    %49 = vector.broadcast %41 : vector<32x1xf32> to vector<32x32xf32>
    %50 = arith.subf %37, %49 : vector<32x32xf32>
    %cst_24 = arith.constant 9.99999974E-6 : f32
    %51 = vector.broadcast %cst_24 : f32 to vector<32x1xf32>
    %52 = arith.addf %48, %51 : vector<32x1xf32>
    %53 = math.rsqrt %52 : vector<32x1xf32>
    %54 = vector.broadcast %53 : vector<32x1xf32> to vector<32x32xf32>
    %55 = arith.mulf %50, %54 : vector<32x32xf32>
    %c513 = arith.constant 513 : index
    %c0_25 = arith.constant 0 : index
    %56 = vector.load %arg2[%c513, %c0_25] : memref<520x128xf32, #tpu.memory_space<vmem>>, vector<1x32xf32>
    %57 = vector.broadcast %56 : vector<1x32xf32> to vector<32x32xf32>
    %58 = arith.mulf %55, %57 : vector<32x32xf32>
    %c514 = arith.constant 514 : index
    %c0_26 = arith.constant 0 : index
    %59 = vector.load %arg2[%c514, %c0_26] : memref<520x128xf32, #tpu.memory_space<vmem>>, vector<1x32xf32>
    %60 = vector.broadcast %59 : vector<1x32xf32> to vector<32x32xf32>
    %61 = arith.addf %58, %60 : vector<32x32xf32>
    %c416 = arith.constant 416 : index
    %c0_27 = arith.constant 0 : index
    %62 = vector.load %arg2[%c416, %c0_27] : memref<520x128xf32, #tpu.memory_space<vmem>>, vector<32x64xf32>
    %cst_28 = arith.constant dense<0.000000e+00> : vector<32x64xf32>
    %63 = tpu.matmul %61, %62, %cst_28 {dimension_numbers = #tpu.dot_dimension_numbers<[1], [0], [0], [1], [0, 0, 1, 1], [], []>} : vector<32x32xf32>, vector<32x64xf32>, vector<32x64xf32> -> vector<32x64xf32>
    %c515 = arith.constant 515 : index
    %c0_29 = arith.constant 0 : index
    %64 = vector.load %arg2[%c515, %c0_29] : memref<520x128xf32, #tpu.memory_space<vmem>>, vector<1x64xf32>
    %65 = vector.broadcast %64 : vector<1x64xf32> to vector<32x64xf32>
    %66 = arith.addf %63, %65 : vector<32x64xf32>
    %cst_30 = arith.constant 5.000000e-01 : f32
    %67 = vector.broadcast %cst_30 : f32 to vector<32x64xf32>
    %68 = arith.mulf %67, %66 : vector<32x64xf32>
    %cst_31 = arith.constant 2.000000e+00 : f32
    %69 = math.sqrt %cst_31 : f32
    %70 = vector.broadcast %69 : f32 to vector<32x64xf32>
    %71 = arith.divf %66, %70 : vector<32x64xf32>
    %72 = math.erf %71 : vector<32x64xf32>
    %cst_32 = arith.constant 1.000000e+00 : f32
    %73 = vector.broadcast %cst_32 : f32 to vector<32x64xf32>
    %74 = arith.addf %73, %72 : vector<32x64xf32>
    %75 = arith.mulf %68, %74 : vector<32x64xf32>
    %c448 = arith.constant 448 : index
    %c0_33 = arith.constant 0 : index
    %76 = vector.load %arg2[%c448, %c0_33] : memref<520x128xf32, #tpu.memory_space<vmem>>, vector<64x32xf32>
    %cst_34 = arith.constant dense<0.000000e+00> : vector<32x32xf32>
    %77 = tpu.matmul %75, %76, %cst_34 {dimension_numbers = #tpu.dot_dimension_numbers<[1], [0], [0], [1], [0, 0, 1, 1], [], []>} : vector<32x64xf32>, vector<64x32xf32>, vector<32x32xf32> -> vector<32x32xf32>
    %c516 = arith.constant 516 : index
    %c0_35 = arith.constant 0 : index
    %78 = vector.load %arg2[%c516, %c0_35] : memref<520x128xf32, #tpu.memory_space<vmem>>, vector<1x32xf32>
    %79 = vector.broadcast %78 : vector<1x32xf32> to vector<32x32xf32>
    %80 = arith.addf %77, %79 : vector<32x32xf32>
    %81 = arith.addf %61, %80 : vector<32x32xf32>
    %cst_36 = arith.constant dense<0.000000e+00> : vector<32xf32>
    %82 = vector.multi_reduction <add>, %81, %cst_36 [1] : vector<32x32xf32> to vector<32xf32>
    %83 = vector.shape_cast %82 : vector<32xf32> to vector<32x1xf32>
    %cst_37 = arith.constant 3.200000e+01 : f32
    %84 = vector.broadcast %cst_37 : f32 to vector<32x1xf32>
    %85 = arith.divf %83, %84 : vector<32x1xf32>
    %86 = vector.broadcast %85 : vector<32x1xf32> to vector<32x32xf32>
    %87 = arith.subf %81, %86 : vector<32x32xf32>
    %88 = arith.mulf %87, %87 : vector<32x32xf32>
    %cst_38 = arith.constant dense<0.000000e+00> : vector<32xf32>
    %89 = vector.multi_reduction <add>, %88, %cst_38 [1] : vector<32x32xf32> to vector<32xf32>
    %90 = vector.shape_cast %89 : vector<32xf32> to vector<32x1xf32>
    %cst_39 = arith.constant 3.200000e+01 : f32
    %91 = vector.broadcast %cst_39 : f32 to vector<32x1xf32>
    %92 = arith.divf %90, %91 : vector<32x1xf32>
    %93 = vector.broadcast %85 : vector<32x1xf32> to vector<32x32xf32>
    %94 = arith.subf %81, %93 : vector<32x32xf32>
    %cst_40 = arith.constant 9.99999974E-6 : f32
    %95 = vector.broadcast %cst_40 : f32 to vector<32x1xf32>
    %96 = arith.addf %92, %95 : vector<32x1xf32>
    %97 = math.rsqrt %96 : vector<32x1xf32>
    %98 = vector.broadcast %97 : vector<32x1xf32> to vector<32x32xf32>
    %99 = arith.mulf %94, %98 : vector<32x32xf32>
    %c517 = arith.constant 517 : index
    %c0_41 = arith.constant 0 : index
    %100 = vector.load %arg2[%c517, %c0_41] : memref<520x128xf32, #tpu.memory_space<vmem>>, vector<1x32xf32>
    %101 = vector.broadcast %100 : vector<1x32xf32> to vector<32x32xf32>
    %102 = arith.mulf %99, %101 : vector<32x32xf32>
    %c518 = arith.constant 518 : index
    %c0_42 = arith.constant 0 : index
    %103 = vector.load %arg2[%c518, %c0_42] : memref<520x128xf32, #tpu.memory_space<vmem>>, vector<1x32xf32>
    %104 = vector.broadcast %103 : vector<1x32xf32> to vector<32x32xf32>
    %105 = arith.addf %102, %104 : vector<32x32xf32>
    %c0_43 = arith.constant 0 : index
    %c0_44 = arith.constant 0 : index
    %106 = vector.load %arg3[%c0_43, %c0_44] : memref<32x32xf32, #tpu.memory_space<vmem>>, vector<32x32xf32>
    tpu.vector_store %arg3[%c0_43, %c0_44], %105 {strides = array<i32>} : memref<32x32xf32, #tpu.memory_space<vmem>>, vector<32x32xf32>,
    return
  }
  func.func @transform_0(%arg0: i32) -> (i32, i32) {
    %c0_i32 = arith.constant 0 : i32
    %c0_i32_0 = arith.constant 0 : i32
    %c0_i32_1 = arith.constant 0 : i32
    return %c0_i32, %c0_i32_0 : i32, i32
  }
  func.func @transform_1(%arg0: i32) -> (i32, i32) {
    %c0_i32 = arith.constant 0 : i32
    %c0_i32_0 = arith.constant 0 : i32
    %c0_i32_1 = arith.constant 0 : i32
    return %c0_i32, %c0_i32_0 : i32, i32
  }
  func.func @transform_2(%arg0: i32) -> (i32, i32) {
    %c0_i32 = arith.constant 0 : i32
    %c0_i32_0 = arith.constant 0 : i32
    %c0_i32_1 = arith.constant 0 : i32
    return %c0_i32, %c0_i32_0 : i32, i32
  }
}

</mosaic_0001>

<bundles_post_ra>
// kernel: tpu_custom_call.1
= control target key start
LH: loop header
LB: loop body
LE: loop exit
PB: predicated region body
PF: predicated region fallthrough
CT: control target
= control target key end

     0   :  { %7 = vsyncpa [#allocation3], 0  ;;  %s1939_s0 = inlined_call_operand.hbm [shape: f32[32,32], index: 0, kind: input, shape index: {}]   ;;  %s1940_s1 = inlined_call_operand.hbm [shape: f32[520,128], index: 1, kind: input, shape index: {}]   ;;  %s1941_s2 = inlined_call_operand.hbm [shape: f32[32,32], index: 2, kind: output, shape index: {}]  }
   0x1   :  { %8 = vsyncpa [#allocation6], 0 }
   0x2   :  { %9 = vsyncpa [#allocation4], 0  ;;  %s1767_s9 = smov [#allocation2]  }
   0x3   :  { %s15_s10 = sshll.u32 %s1767_s9, 4  ;;  %s16_s10 = int_to_ptr.vmem [resolvable:$true] %s15_s10 }
   0x4   :  { %s1709_s11 = scalar_lea.vmem %s16_s10, 512  ;;  %p1714_p1 = scmp.lt.s32.totalorder %s16_s10, %s16_s10 }
   0x5   :  { %p1710_p0 = scmp.ne.s32.totalorder %s16_s10, %s1709_s11  ;;  %p1715_p2 = scmp.lt.s32.totalorder %s1709_s11, %s1709_s11 }
   0x7   :  { %p1716_p3 = por %p1715_p2, %p1714_p1 }
   0x9   :  { %p1717_p4 = pnand %p1716_p3, %p1710_p0 }
   0xb   :  { %1720 = shalt.err (!%p1717_p4)
}
   0xc   :  { %s1768_s12 = smov 128   ;;  %s1769_s13 = smov 8  }
   0xd   :  { %21 = dma.hbm_to_vmem [thread:$0]  %s1939_s0, 512, %s16_s10, [#allocation3], %s1768_s12, %s1768_s12, %s1769_s13  }
   0xe   :  { %s1770_s16 = smov [#allocation5]  }
   0xf   :  { %s27_s17 = sshll.u32 %s1770_s16, 4  ;;  %s28_s17 = int_to_ptr.vmem [resolvable:$true] %s27_s17 }
  0x10   :  { %s1729_s18 = scalar_lea.vmem %s28_s17, 8320  ;;  %p1734_p6 = scmp.lt.s32.totalorder %s28_s17, %s28_s17 }
  0x11   :  { %p1730_p5 = scmp.ne.s32.totalorder %s28_s17, %s1729_s18  ;;  %p1735_p7 = scmp.lt.s32.totalorder %s1729_s18, %s1729_s18 }
  0x13   :  { %p1736_p8 = por %p1735_p7, %p1734_p6 }
  0x15   :  { %p1737_p9 = pnand %p1736_p8, %p1730_p5 }
  0x17   :  { %1740 = shalt.err (!%p1737_p9)
}
  0x18   :  { %33 = dma.hbm_to_vmem [thread:$0]  %s1940_s1, 8320, %s28_s17, [#allocation6], %s1768_s12, %s1768_s12, %s1769_s13  }
  0x19   :  { %1761 = dma.done.wait [#allocation3], 512  }
  0x1a   :  { %1762 = vsyncadd [#allocation3], 4294966784 }
  0x1b   :  { %1763 = dma.done.wait [#allocation6], 8320  }
  0x1c   :  { %1764 = vsyncadd [#allocation6], 4294958976  ;;  %vm48_vm0 = vcmask 261120   ;;  %v47_v0 = vld [vmem:[#allocation5 + $0x18] sm:$0xff]  ;;  %v46_v1 = vld [vmem:[#allocation5 + $0x10] sm:$0xff]  ;;  %s1771_s0 = smov 96  }
  0x1d   :  { %1489 = vmatprep.subr.mxu1 %v47_v0  ;;  %v1801_v2 = vld [vmem:[#allocation2] sm:$0xff]  ;;  %v45_v3 = vld [vmem:[#allocation5 + $0x8] sm:$0xff]  ;;  %v1807_v6 = vld [vmem:[#allocation2 + $0x10] sm:$0xff]  ;;  %s1772_s1 = smov 64   ;;  %vm581_vm1 = vcmask 523264   ;;  %s1773_s21 = smov [#allocation7]  }
  0x1e   :  { %1490 = vmatpush3.msra.mxu1 %v47_v0  ;;  %1497 = vmatprep.mubr.msk.f32.mxu1 %vm48_vm0, %v1801_v2  ;;  %v44_v4 = vld [vmem:[#allocation5] sm:$0xff]  ;;  %v1805_v5 = vld [vmem:[#allocation2 + $0x8] sm:$0xff]  ;;  %v1813_v7 = vld [vmem:[#allocation2 + $0x18] sm:$0xff]  ;;  %s1329_s22 = sshll.u32 %s1773_s21, 4  ;;  %s1330_s22 = int_to_ptr.vmem [resolvable:$true] %s1329_s22 }
  0x1f   :  { %1491 = vmatprep.subr.mxu1 %v46_v1  ;;  %v146_v12 = vld [vmem:[#allocation5 + $0x20] sm:$0xff]  ;;  %v153_v13 = vld [vmem:[#allocation5 + $0x58] sm:$0xff]  ;;  %v152_v14 = vld [vmem:[#allocation5 + $0x50] sm:$0xff]  ;;  %s1741_s23 = scalar_lea.vmem %s1330_s22, 512  ;;  %p1746_p11 = scmp.lt.s32.totalorder %s1330_s22, %s1330_s22 }
  0x20   :  { %1492 = vmatpush3.msra.mxu1 %v46_v1  ;;  %1533 = vmatprep.mubr.msk.f32.mxu0 %vm48_vm0, %v146_v12  ;;  %v151_v15 = vld [vmem:[#allocation5 + $0x48] sm:$0xff]  ;;  %v150_v16 = vld [vmem:[#allocation5 + $0x40] sm:$0xff]  ;;  %v149_v17 = vld [vmem:[#allocation5 + $0x38] sm:$0xff]  ;;  %p1742_p10 = scmp.ne.s32.totalorder %s1330_s22, %s1741_s23  ;;  %p1747_p12 = scmp.lt.s32.totalorder %s1741_s23, %s1741_s23 }
  0x21   :  { %1493 = vmatprep.subr.mxu1 %v45_v3  ;;  %v148_v18 = vld [vmem:[#allocation5 + $0x30] sm:$0xff]  ;;  %v147_v19 = vld [vmem:[#allocation5 + $0x28] sm:$0xff]  ;;  %v463_v39 = vld [vmem:[#allocation5 + $0xd8] sm:$0xff] }
  0x22   :  { %1494 = vmatpush3.msra.mxu1 %v45_v3  ;;  %v461_v37 = vld [vmem:[#allocation5 + $0xc8] sm:$0xff]  ;;  %v460_v40 = vld [vmem:[#allocation5 + $0xc0] sm:$0xff]  ;;  %v479_v42 = vld [vmem:[#allocation5 + $0x118] sm:$0xff]  ;;  %p1748_p13 = por %p1747_p12, %p1746_p11 }
  0x23   :  { %1495 = vmatprep.subr.mxu1 %v44_v4  ;;  %v462_v43 = vld [vmem:[#allocation5 + $0xd0] sm:$0xff]  ;;  %v459_v46 = vld [vmem:[#allocation5 + $0xb8] sm:$0xff]  ;;  %v477_v47 = vld [vmem:[#allocation5 + $0x108] sm:$0xff] }
  0x24   :  { %1496 = vmatpush3.msra.mxu1 %v44_v4  ;;  %v478_v49 = vld [vmem:[#allocation5 + $0x110] sm:$0xff]  ;;  %v476_v54 = vld [vmem:[#allocation5 + $0x100] sm:$0xff]  ;;  %v457_v58 = vld [vmem:[#allocation5 + $0xa8] sm:$0xff]  ;;  %p1749_p0 = pnand %p1748_p13, %p1742_p10 }
  0x25   :  { %1498 = vmatmul.mubr.msk.f32.vlgmr.msra.gmra.mxu1 %vm48_vm0, %v1805_v5  ;;  %1503 = vmatprep.subr.msk.mxu1 %vm48_vm0, %v153_v13  ;;  %v458_v53 = vld [vmem:[#allocation5 + $0xb0] sm:$0xff]  ;;  %v475_v59 = vld [vmem:[#allocation5 + $0xf8] sm:$0xff]  ;;  %v456_v62 = vld [vmem:[#allocation5 + $0xa0] sm:$0xff] }
  0x26   :  { %1500 = vmatprep.mubr.msk.f32.mxu1 %vm48_vm0, %v1807_v6  ;;  %1504 = vmatpush3.xpose.msk.msra.mxu1 %vm48_vm0, %v153_v13  ;;  %v474_v63 = vld [vmem:[#allocation5 + $0xf0] sm:$0xff]  ;;  %v473_v3 = vld [vmem:[#allocation5 + $0xe8] sm:$0xff] }
  0x27   :  { %1505 = vmatprep.subr.msk.mxu1 %vm48_vm0, %v152_v14 }
  0x29   :  { %1501 = vmatmul.mubr.msk.f32.gmra.mxu1 %vm48_vm0, %v1813_v7 }
  0x2a   :  { %1506 = vmatpush3.xpose.msk.msra.mxu1 %vm48_vm0, %v152_v14 }
  0x2b   :  { %1507 = vmatprep.subr.msk.mxu1 %vm48_vm0, %v151_v15 }
  0x2e   :  { %1508 = vmatpush3.xpose.msk.msra.mxu1 %vm48_vm0, %v151_v15 }
  0x2f   :  { %1509 = vmatprep.subr.msk.mxu1 %vm48_vm0, %v150_v16 }
  0x32   :  { %1510 = vmatpush3.xpose.msk.msra.mxu1 %vm48_vm0, %v150_v16 }
  0x33   :  { %1511 = vmatprep.subr.msk.mxu1 %vm48_vm0, %v149_v17 }
  0x36   :  { %1512 = vmatpush3.xpose.msk.msra.mxu1 %vm48_vm0, %v149_v17 }
  0x37   :  { %1513 = vmatprep.subr.msk.mxu1 %vm48_vm0, %v148_v18 }
  0x3a   :  { %1514 = vmatpush3.xpose.msk.msra.mxu1 %vm48_vm0, %v148_v18 }
  0x3b   :  { %1515 = vmatprep.subr.msk.mxu1 %vm48_vm0, %v147_v19 }
  0x3e   :  { %1516 = vmatpush3.xpose.msk.msra.mxu1 %vm48_vm0, %v147_v19 }
  0x3f   :  { %1517 = vmatprep.subr.msk.mxu1 %vm48_vm0, %v146_v12 }
  0x42   :  { %1518 = vmatpush3.xpose.msk.msra.mxu1 %vm48_vm0, %v146_v12  ;;  %v472_v12 = vld [vmem:[#allocation5 + $0xe0] sm:$0xff] }
  0xe5   :  { %v1817_v8 = vpop.f32.mrf.mxu1 }
  0xe7   :  { %v1819_v9 = vpop.f32.mrf.mxu1 }
  0xe8   :  { %158 = vrot.lane.b32.xlu0 %v1819_v9, %s1771_s0 }
  0xe9   :  { %v1822_v10 = vpop.f32.mrf.mxu1 }
  0xeb   :  { %v1824_v11 = vpop.f32.mrf.mxu1 }
  0xec   :  { %160 = vrot.lane.b32.xlu0 %v1817_v8, %s1771_s0  ;;  %162 = vrot.lane.b32.xlu1 %v1824_v11, %s1771_s0 }
  0xf0   :  { %164 = vrot.lane.b32.xlu1 %v1822_v10, %s1771_s0 }
  0xf4   :  { %345 = vrot.lane.b32.xlu1 %v1822_v10, %s1772_s1 }
  0xf8   :  { %343 = vrot.lane.b32.xlu1 %v1824_v11, %s1772_s1 }
  0xfc   :  { %341 = vrot.lane.b32.xlu1 %v1817_v8, %s1772_s1 }
 0x100   :  { %339 = vrot.lane.b32.xlu1 %v1819_v9, %s1772_s1 }
 0x15a   :  { %v159_v20 = vpop.permute.xlu0 %158 }
 0x15b   :  { %170 = vxpose.xlu0.b32.start [1/4] (short) (narrow) %v159_v20, 32  ;;  %v334_v20 = vld [vmem:[#allocation5 + $0x98] sm:$0xff] }
 0x15e   :  { %v161_v21 = vpop.permute.xlu0 %160  ;;  %v163_v22 = vpop.permute.xlu1 %162 }
 0x15f   :  { %171 = vxpose.xlu0.b32.cont [2/4] (short) (narrow) %v161_v21, 32  ;;  %v325_v21 = vld [vmem:[#allocation5 + $0x70] sm:$0xff] }
 0x162   :  { %v165_v23 = vpop.permute.xlu1 %164 }
 0x163   :  { %172 = vxpose.xlu0.b32.cont [3/4] (short) (narrow) %v163_v22, 32 }
 0x166   :  { %v346_v24 = vpop.permute.xlu1 %345 }
 0x167   :  { %1525 = vmatprep.subr.mxu0 %v346_v24  ;;  %173 = vxpose.xlu0.b32.end [4/4] (short) (narrow) %v165_v23, 32  ;;  %v323_v23 = vld [vmem:[#allocation5 + $0x60] sm:$0xff] }
 0x168   :  { %1526 = vmatpush3.msra.mxu0 %v346_v24 }
 0x16a   :  { %v344_v25 = vpop.permute.xlu1 %343 }
 0x16b   :  { %1527 = vmatprep.subr.mxu0 %v344_v25 }
 0x16c   :  { %1528 = vmatpush3.msra.mxu0 %v344_v25  ;;  %v333_v25 = vld [vmem:[#allocation5 + $0x90] sm:$0xff] }
 0x16e   :  { %v342_v26 = vpop.permute.xlu1 %341 }
 0x16f   :  { %1529 = vmatprep.subr.mxu0 %v342_v26 }
 0x170   :  { %1530 = vmatpush3.msra.mxu0 %v342_v26 }
 0x172   :  { %v340_v27 = vpop.permute.xlu1 %339 }
 0x173   :  { %1531 = vmatprep.subr.mxu0 %v340_v27 }
 0x174   :  { %1532 = vmatpush3.msra.mxu0 %v340_v27 }
 0x175   :  { %1534 = vmatmul.mubr.msk.f32.vlgmr.msra.gmra.mxu0 %vm48_vm0, %v147_v19 }
 0x176   :  { %1536 = vmatprep.mubr.msk.f32.mxu0 %vm48_vm0, %v148_v18  ;;  %v324_v18 = vld [vmem:[#allocation5 + $0x68] sm:$0xff] }
 0x179   :  { %1537 = vmatmul.mubr.msk.f32.gmra.mxu0 %vm48_vm0, %v149_v17  ;;  %v326_v17 = vld [vmem:[#allocation5 + $0x78] sm:$0xff] }
 0x17a   :  { %1539 = vmatprep.mubr.msk.f32.mxu0 %vm48_vm0, %v150_v16 }
 0x17d   :  { %1540 = vmatmul.mubr.msk.f32.gmra.mxu0 %vm48_vm0, %v151_v15 }
 0x17e   :  { %1542 = vmatprep.mubr.msk.f32.mxu0 %vm48_vm0, %v152_v14 }
 0x181   :  { %1543 = vmatmul.mubr.msk.f32.gmra.mxu0 %vm48_vm0, %v153_v13 }
 0x182   :  { %1553 = vmatprep.mubr.msk.f32.mxu0 %vm48_vm0, %v1819_v9 }
 0x1d7   :  { %v186_v28 = vpop.trf.xlu0 }
 0x1d8   :  { %1519 = vmatprep.mubr.msk.f32.mxu1 %vm48_vm0, %v186_v28 }
 0x1db   :  { %v187_v29 = vpop.trf.xlu0 }
 0x1dc   :  { %1520 = vmatmul.mubr.msk.f32.vlgmr.msra.gmra.mxu1 %vm48_vm0, %v187_v29  ;;  %v332_v29 = vld [vmem:[#allocation5 + $0x88] sm:$0xff] }
 0x1df   :  { %v188_v30 = vpop.trf.xlu0 }
 0x1e0   :  { %1522 = vmatprep.mubr.msk.f32.mxu1 %vm48_vm0, %v188_v30 }
 0x1e3   :  { %v189_v31 = vpop.trf.xlu0 }
 0x1e4   :  { %1523 = vmatmul.mubr.msk.f32.gmra.mxu1 %vm48_vm0, %v189_v31 }
 0x235   :  { %v1535_v32 = vpop.f32.mrf.mxu0 }
 0x236   :  { %v465_v0 = vmul.f32 %v1535_v32, %v457_v58  ;;  %v331_v32 = vld [vmem:[#allocation5 + $0x80] sm:$0xff] }
 0x237   :  { %v417_v33 = vpop.f32.mrf.mxu0 }
 0x238   :  { %v464_v4 = vmul.f32 %v456_v62, %v417_v33  ;;  %v481_v13 = vadd.f32 %v473_v3, %v465_v0  ;;  %v831_v0 = vld [vmem:[#allocation5 + $0x198] sm:$0xff] }
 0x239   :  { %v1538_v34 = vpop.f32.mrf.mxu0 }
 0x23a   :  { %v467_v55 = vmul.f32 %v1538_v34, %v459_v46  ;;  %v480_v14 = vadd.f32 %v472_v12, %v464_v4  ;;  %v607_v46 = vld [vmem:[#allocation5 + $0x128] sm:$0xff] }
 0x23b   :  { %v427_v35 = vpop.f32.mrf.mxu0 }
 0x23c   :  { %v466_v60 = vmul.f32 %v458_v53, %v427_v35  ;;  %v483_v1 = vadd.f32 %v475_v59, %v467_v55 }
 0x23d   :  { %v1541_v36 = vpop.f32.mrf.mxu0 }
 0x23e   :  { %v469_v44 = vmul.f32 %v1541_v36, %v461_v37  ;;  %v482_v9 = vadd.f32 %v474_v63, %v466_v60 }
 0x23f   :  { %v437_v38 = vpop.f32.mrf.mxu0 }
 0x240   :  { %v468_v50 = vmul.f32 %v460_v40, %v437_v38  ;;  %v485_v56 = vadd.f32 %v477_v47, %v469_v44  ;;  %v609_v44 = vld [vmem:[#allocation5 + $0x138] sm:$0xff]  ;;  %v606_v47 = vld [vmem:[#allocation5 + $0x120] sm:$0xff] }
 0x241   :  { %v1544_v41 = vpop.f32.mrf.mxu0 }
 0x242   :  { %v471_v45 = vmul.f32 %v1544_v41, %v463_v39  ;;  %v484_v61 = vadd.f32 %v476_v54, %v468_v50 }
 0x243   :  { %v447_v48 = vpop.f32.mrf.mxu0 }
 0x244   :  { %v487_v51 = vadd.f32 %v479_v42, %v471_v45  ;;  %v470_v52 = vmul.f32 %v462_v43, %v447_v48  ;;  %v611_v42 = vld [vmem:[#allocation5 + $0x148] sm:$0xff]  ;;  %v610_v43 = vld [vmem:[#allocation5 + $0x140] sm:$0xff]  ;;  %v608_v45 = vld [vmem:[#allocation5 + $0x130] sm:$0xff] }
 0x246   :  { %v486_v57 = vadd.f32 %v478_v49, %v470_v52  ;;  %1581 = vmatprep.subr.mxu1 %v487_v51 }
 0x247   :  { %1582 = vmatpush3.msra.mxu1 %v487_v51 }
 0x248   :  { %1583 = vmatprep.subr.mxu1 %v486_v57 }
 0x249   :  { %1584 = vmatpush3.msra.mxu1 %v486_v57 }
 0x24a   :  { %1585 = vmatprep.subr.mxu1 %v485_v56 }
 0x24b   :  { %1586 = vmatpush3.msra.mxu1 %v485_v56 }
 0x24c   :  { %1587 = vmatprep.subr.mxu1 %v484_v61 }
 0x24d   :  { %1588 = vmatpush3.msra.mxu1 %v484_v61 }
 0x24e   :  { %1589 = vmatprep.subr.mxu1 %v483_v1 }
 0x24f   :  { %1590 = vmatpush3.msra.mxu1 %v483_v1  ;;  %v830_v1 = vld [vmem:[#allocation5 + $0x190] sm:$0xff] }
 0x250   :  { %1591 = vmatprep.subr.mxu1 %v482_v9 }
 0x251   :  { %1592 = vmatpush3.msra.mxu1 %v482_v9 }
 0x252   :  { %1593 = vmatprep.subr.mxu1 %v481_v13 }
 0x253   :  { %1594 = vmatpush3.msra.mxu1 %v481_v13 }
 0x254   :  { %1595 = vmatprep.subr.mxu1 %v480_v14 }
 0x255   :  { %1596 = vmatpush3.msra.mxu1 %v480_v14 }
 0x29c   :  { %v1521_v15 = vpop.f32.mrf.mxu1 }
 0x29d   :  { %v328_v26 = vmul.f32 %v1521_v15, %v324_v18 }
 0x29e   :  { %v304_v16 = vpop.f32.mrf.mxu1 }
 0x29f   :  { %v327_v30 = vmul.f32 %v323_v23, %v304_v16  ;;  %v336_v33 = vadd.f32 %v332_v29, %v328_v26 }
 0x2a1   :  { %v335_v34 = vadd.f32 %v331_v32, %v327_v30  ;;  %v726_v30 = vld [vmem:[#allocation5 + $0x178] sm:$0xff] }
 0x2a4   :  { %v1524_v19 = vpop.f32.mrf.mxu1 }
 0x2a5   :  { %v330_v22 = vmul.f32 %v1524_v19, %v326_v17 }
 0x2a6   :  { %v314_v24 = vpop.f32.mrf.mxu1 }
 0x2a7   :  { %v338_v27 = vadd.f32 %v334_v20, %v330_v22  ;;  %v329_v28 = vmul.f32 %v325_v21, %v314_v24  ;;  %v723_v20 = vld [vmem:[#allocation5 + $0x160] sm:$0xff]  ;;  %v724_v21 = vld [vmem:[#allocation5 + $0x168] sm:$0xff] }
 0x2a9   :  { %v337_v31 = vadd.f32 %v333_v25, %v329_v28  ;;  %1545 = vmatprep.subr.mxu0 %v338_v27 }
 0x2aa   :  { %1546 = vmatpush3.msra.mxu0 %v338_v27  ;;  %v725_v27 = vld [vmem:[#allocation5 + $0x170] sm:$0xff] }
 0x2ab   :  { %1547 = vmatprep.subr.mxu0 %v337_v31 }
 0x2ac   :  { %1548 = vmatpush3.msra.mxu0 %v337_v31 }
 0x2ad   :  { %1549 = vmatprep.subr.mxu0 %v336_v33 }
 0x2ae   :  { %1550 = vmatpush3.msra.mxu0 %v336_v33  ;;  %v829_v33 = vld [vmem:[#allocation5 + $0x188] sm:$0xff] }
 0x2af   :  { %1551 = vmatprep.subr.mxu0 %v335_v34 }
 0x2b0   :  { %1552 = vmatpush3.msra.mxu0 %v335_v34  ;;  %v828_v34 = vld [vmem:[#allocation5 + $0x180] sm:$0xff] }
 0x2b1   :  { %1554 = vmatmul.mubr.msk.f32.vlgmr.msra.gmra.mxu0 %vm48_vm0, %v1817_v8 }
 0x2b2   :  { %1556 = vmatprep.mubr.msk.f32.mxu0 %vm48_vm0, %v1824_v11  ;;  %v613_v11 = vld [vmem:[#allocation5 + $0x158] sm:$0xff] }
 0x2b3   :  { %1559 = vmatprep.subr.mxu0 %v613_v11 }
 0x2b4   :  { %1560 = vmatpush3.msra.mxu0 %v613_v11 }
 0x2b5   :  { %1557 = vmatmul.mubr.msk.f32.gmra.mxu0 %vm48_vm0, %v1822_v10  ;;  %v612_v10 = vld [vmem:[#allocation5 + $0x150] sm:$0xff] }
 0x2b6   :  { %1561 = vmatprep.subr.mxu0 %v612_v10 }
 0x2b7   :  { %1562 = vmatpush3.msra.mxu0 %v612_v10 }
 0x2b8   :  { %1563 = vmatprep.subr.mxu0 %v611_v42 }
 0x2b9   :  { %1564 = vmatpush3.msra.mxu0 %v611_v42 }
 0x2ba   :  { %1565 = vmatprep.subr.mxu0 %v610_v43 }
 0x2bb   :  { %1566 = vmatpush3.msra.mxu0 %v610_v43 }
 0x2bc   :  { %1567 = vmatprep.subr.mxu0 %v609_v44 }
 0x2bd   :  { %1568 = vmatpush3.msra.mxu0 %v609_v44 }
 0x2be   :  { %1569 = vmatprep.subr.mxu0 %v608_v45 }
 0x2bf   :  { %1570 = vmatpush3.msra.mxu0 %v608_v45 }
 0x2c0   :  { %1571 = vmatprep.subr.mxu0 %v607_v46 }
 0x2c1   :  { %1572 = vmatpush3.msra.mxu0 %v607_v46 }
 0x2c2   :  { %1573 = vmatprep.subr.mxu0 %v606_v47 }
 0x2c3   :  { %1574 = vmatpush3.msra.mxu0 %v606_v47 }
 0x2c4   :  { %1603 = vmatprep.subr.mxu0 %v831_v0 }
 0x371   :  { %v1555_v35 = vpop.f32.mrf.mxu0 }
 0x372   :  { %v585_v36 = vsel %vm581_vm1, %v1555_v35, -inf }
 0x373   :  { %586 = vmax.xlane.f32.xlu0 %v585_v36  ;;  %v562_v37 = vpop.f32.mrf.mxu0 }
 0x374   :  { %v582_v38 = vsel %vm581_vm1, %v562_v37, -inf }
 0x375   :  { %583 = vmax.xlane.f32.xlu1 %v582_v38  ;;  %v1558_v39 = vpop.f32.mrf.mxu0 }
 0x376   :  { %v591_v8 = vsel %vm581_vm1, %v1558_v39, -inf }
 0x377   :  { %v572_v40 = vpop.f32.mrf.mxu0 }
 0x378   :  { %v588_v41 = vsel %vm581_vm1, %v572_v40, -inf }
 0x379   :  { %589 = vmax.xlane.f32.xlu1 %v588_v41 }
 0x37d   :  { %592 = vmax.xlane.f32.xlu1 %v591_v8 }
 0x3fc   :  { %v587_v48 = vpop.xlane.xlu0 %586 }
 0x3fd   :  { %v595_v49 = vsub.f32 %v1555_v35, %v587_v48 }
 0x3fe   :  { %v584_v50 = vpop.xlane.xlu1 %583 }
 0x3ff   :  { %v594_v51 = vsub.f32 %v562_v37, %v584_v50  ;;  %v600_v52 = vmul.f32 1.442695, %v595_v49 }
 0x401   :  { %v598_v53 = vmul.f32 1.442695, %v594_v51 }
 0x402   :  { %v590_v54 = vpop.xlane.xlu1 %589 }
 0x403   :  { %1661 = vpow2.f32 %v598_v53  ;;  %v596_v55 = vsub.f32 %v572_v40, %v590_v54 }
 0x404   :  { %1663 = vpow2.f32 %v600_v52 }
 0x405   :  { %v602_v56 = vmul.f32 1.442695, %v596_v55 }
 0x406   :  { %v593_v57 = vpop.xlane.xlu1 %592 }
 0x407   :  { %1665 = vpow2.f32 %v602_v56  ;;  %v597_v58 = vsub.f32 %v1558_v39, %v593_v57  ;;  %v1378_v39 = vld [vmem:[#allocation5 + $0x200] ss:$0 sm:$0xff] }
 0x409   :  { %v604_v59 = vmul.f32 1.442695, %v597_v58 }
 0x40b   :  { %1667 = vpow2.f32 %v604_v59 }
 0x410   :  { %v1662_v60 = vpop.eup %1661 }
 0x411   :  { %v1664_v61 = vpop.eup %1663  ;;  %1575 = vmatprep.mubr.msk.f32.mxu0 %vm581_vm1, %v1662_v60 }
 0x412   :  { %1576 = vmatmul.mubr.msk.f32.vlgmr.msra.gmra.mxu0 %vm581_vm1, %v1664_v61 }
 0x413   :  { %1604 = vmatpush3.msra.mxu0 %v831_v0 }
 0x414   :  { %v1666_v62 = vpop.eup %1665  ;;  %1605 = vmatprep.subr.mxu0 %v830_v1 }
 0x415   :  { %1578 = vmatprep.mubr.msk.f32.mxu0 %vm581_vm1, %v1666_v62  ;;  %1606 = vmatpush3.msra.mxu0 %v830_v1 }
 0x416   :  { %1607 = vmatprep.subr.mxu0 %v829_v33 }
 0x417   :  { %1608 = vmatpush3.msra.mxu0 %v829_v33 }
 0x418   :  { %v1668_v63 = vpop.eup %1667  ;;  %1609 = vmatprep.subr.mxu0 %v828_v34 }
 0x419   :  { %1579 = vmatmul.mubr.msk.f32.gmra.mxu0 %vm581_vm1, %v1668_v63 }
 0x41a   :  { %1610 = vmatpush3.msra.mxu0 %v828_v34 }
 0x4d2   :  { %v1577_v3 = vpop.f32.mrf.mxu0 }
 0x4d3   :  { %v712_v4 = vmax.f32 %v1577_v3, 1e-30 }
 0x4d4   :  { %v692_v9 = vpop.f32.mrf.mxu0 }
 0x4d5   :  { %1669 = vrcp.f32 %v712_v4  ;;  %v711_v12 = vmax.f32 %v692_v9, 1e-30 }
 0x4d7   :  { %1671 = vrcp.f32 %v711_v12  ;;  %v1012_v12 = vld [vmem:[#allocation5 + $0x1b8] sm:$0xff] }
 0x4d8   :  { %1617 = vmatprep.subr.mxu1 %v1012_v12 }
 0x4d9   :  { %v1580_v13 = vpop.f32.mrf.mxu0 }
 0x4da   :  { %v714_v14 = vmax.f32 %v1580_v13, 1e-30  ;;  %v1011_v13 = vld [vmem:[#allocation5 + $0x1b0] sm:$0xff] }
 0x4db   :  { %v702_v15 = vpop.f32.mrf.mxu0 }
 0x4dc   :  { %1673 = vrcp.f32 %v714_v14  ;;  %v713_v16 = vmax.f32 %v702_v15, 1e-30  ;;  %v1010_v14 = vld [vmem:[#allocation5 + $0x1a8] sm:$0xff]  ;;  %v1009_v15 = vld [vmem:[#allocation5 + $0x1a0] sm:$0xff] }
 0x4de   :  { %1675 = vrcp.f32 %v713_v16 }
 0x4e2   :  { %v1670_v17 = vpop.eup %1669 }
 0x4e3   :  { %v720_v19 = vmul.f32 %v1670_v17, %v1664_v61 }
 0x4e4   :  { %v1672_v18 = vpop.eup %1671 }
 0x4e5   :  { %v719_v22 = vmul.f32 %v1672_v18, %v1662_v60  ;;  %v728_v24 = vmul.f32 %v724_v21, %v720_v19 }
 0x4e7   :  { %v727_v23 = vmul.f32 %v723_v20, %v719_v22 }
 0x4e9   :  { %v1674_v25 = vpop.eup %1673  ;;  %1597 = vmatprep.mubr.msk.f32.mxu1 %vm581_vm1, %v727_v23 }
 0x4ea   :  { %1598 = vmatmul.mubr.msk.f32.vlgmr.msra.gmra.mxu1 %vm581_vm1, %v728_v24  ;;  %v722_v28 = vmul.f32 %v1674_v25, %v1668_v63 }
 0x4eb   :  { %v1676_v26 = vpop.eup %1675  ;;  %1618 = vmatpush3.msra.mxu1 %v1012_v12 }
 0x4ec   :  { %v721_v29 = vmul.f32 %v1676_v26, %v1666_v62  ;;  %v730_v32 = vmul.f32 %v726_v30, %v722_v28  ;;  %1619 = vmatprep.subr.mxu1 %v1011_v13  ;;  %v1383_v30 = vld [vmem:[#allocation5 + $0x201] ss:$0 sm:$0xff] }
 0x4ed   :  { %1620 = vmatpush3.msra.mxu1 %v1011_v13 }
 0x4ee   :  { %v729_v31 = vmul.f32 %v725_v27, %v721_v29  ;;  %1621 = vmatprep.subr.mxu1 %v1010_v14 }
 0x4ef   :  { %1622 = vmatpush3.msra.mxu1 %v1010_v14 }
 0x4f0   :  { %1600 = vmatprep.mubr.msk.f32.mxu1 %vm581_vm1, %v729_v31  ;;  %1623 = vmatprep.subr.mxu1 %v1009_v15 }
 0x4f1   :  { %1601 = vmatmul.mubr.msk.f32.gmra.mxu1 %vm581_vm1, %v730_v32 }
 0x4f2   :  { %1624 = vmatpush3.msra.mxu1 %v1009_v15 }
 0x5aa   :  { %v1599_v35 = vpop.f32.mrf.mxu1 }
 0x5ac   :  { %v809_v36 = vpop.f32.mrf.mxu1 }
 0x5ad   :  { %1611 = vmatprep.mubr.msk.f32.mxu0 %vm48_vm0, %v809_v36 }
 0x5ae   :  { %1612 = vmatmul.mubr.msk.f32.vlgmr.msra.gmra.mxu0 %vm48_vm0, %v1599_v35  ;;  %v1384_v35 = vld [vmem:[#allocation5 + $0x202] ss:$0 sm:$0xff] }
 0x5b1   :  { %v1602_v37 = vpop.f32.mrf.mxu1 }
 0x5b3   :  { %v819_v38 = vpop.f32.mrf.mxu1 }
 0x5b4   :  { %1614 = vmatprep.mubr.msk.f32.mxu0 %vm48_vm0, %v819_v38 }
 0x5b5   :  { %1615 = vmatmul.mubr.msk.f32.gmra.mxu0 %vm48_vm0, %v1602_v37 }
 0x66e   :  { %v1613_v40 = vpop.f32.mrf.mxu0 }
 0x66f   :  { %v921_v41 = vadd.f32 %v1613_v40, %v1378_v39 }
 0x670   :  { %v915_v8 = vpop.f32.mrf.mxu0 }
 0x671   :  { %v916_v11 = vadd.f32 %v1378_v39, %v915_v8  ;;  %v935_v10 = vadd.f32 %v921_v41, %v1805_v5 }
 0x673   :  { %v941_v42 = vsel %vm48_vm0, %v935_v10, 0.0  ;;  %v934_v43 = vadd.f32 %v916_v11, %v1801_v2 }
 0x674   :  { %942 = vadd.xlane.f32.xlu1 %v941_v42 }
 0x675   :  { %v1616_v44 = vpop.f32.mrf.mxu0  ;;  %v938_v46 = vsel %vm48_vm0, %v934_v43, 0.0 }
 0x676   :  { %v931_v47 = vadd.f32 %v1616_v44, %v1378_v39  ;;  %v1142_v44 = vld [vmem:[#allocation5 + $0x1f0] sm:$0xff] }
 0x677   :  { %v925_v45 = vpop.f32.mrf.mxu0 }
 0x678   :  { %v926_v48 = vadd.f32 %v1378_v39, %v925_v45  ;;  %939 = vadd.xlane.f32.xlu1 %v938_v46  ;;  %v937_v51 = vadd.f32 %v931_v47, %v1813_v7  ;;  %v1141_v45 = vld [vmem:[#allocation5 + $0x1e8] sm:$0xff]  ;;  %v1140_v46 = vld [vmem:[#allocation5 + $0x1e0] sm:$0xff]  ;;  %v1139_v47 = vld [vmem:[#allocation5 + $0x1d8] sm:$0xff] }
 0x67a   :  { %v936_v49 = vadd.f32 %v926_v48, %v1807_v6  ;;  %v947_v5 = vsel %vm48_vm0, %v937_v51, 0.0  ;;  %v1138_v48 = vld [vmem:[#allocation5 + $0x1d0] sm:$0xff] }
 0x67c   :  { %v944_v50 = vsel %vm48_vm0, %v936_v49, 0.0 }
 0x67d   :  { %945 = vadd.xlane.f32.xlu1 %v944_v50  ;;  %v1136_v50 = vld [vmem:[#allocation5 + $0x1c0] sm:$0xff] }
 0x681   :  { %948 = vadd.xlane.f32.xlu1 %v947_v5 }
 0x6fd   :  { %v943_v52 = vpop.xlane.xlu1 %942 }
 0x6fe   :  { %v952_v2 = vmul.f32 0.03125, %v943_v52 }
 0x700   :  { %v956_v53 = vsub.f32 %v935_v10, %v952_v2 }
 0x701   :  { %v940_v54 = vpop.xlane.xlu1 %939 }
 0x702   :  { %v951_v55 = vmul.f32 0.03125, %v940_v54  ;;  %v960_v56 = vmul.f32 %v956_v53, %v956_v53 }
 0x704   :  { %v955_v57 = vsub.f32 %v934_v43, %v951_v55  ;;  %v966_v58 = vsel %vm48_vm0, %v960_v56, 0.0  ;;  %v1143_v43 = vld [vmem:[#allocation5 + $0x1f8] sm:$0xff] }
 0x705   :  { %967 = vadd.xlane.f32.xlu1 %v966_v58  ;;  %1631 = vmatprep.subr.mxu0 %v1143_v43 }
 0x706   :  { %v946_v59 = vpop.xlane.xlu1 %945  ;;  %v959_v6 = vmul.f32 %v955_v57, %v955_v57  ;;  %1632 = vmatpush3.msra.mxu0 %v1143_v43 }
 0x707   :  { %v953_v60 = vmul.f32 0.03125, %v946_v59  ;;  %1633 = vmatprep.subr.mxu0 %v1142_v44 }
 0x708   :  { %v963_v61 = vsel %vm48_vm0, %v959_v6, 0.0  ;;  %1634 = vmatpush3.msra.mxu0 %v1142_v44 }
 0x709   :  { %v957_v7 = vsub.f32 %v936_v49, %v953_v60  ;;  %964 = vadd.xlane.f32.xlu1 %v963_v61  ;;  %1635 = vmatprep.subr.mxu0 %v1141_v45  ;;  %v1137_v49 = vld [vmem:[#allocation5 + $0x1c8] sm:$0xff] }
 0x70a   :  { %v949_v62 = vpop.xlane.xlu1 %948  ;;  %1636 = vmatpush3.msra.mxu0 %v1141_v45 }
 0x70b   :  { %v954_v63 = vmul.f32 0.03125, %v949_v62  ;;  %v961_v0 = vmul.f32 %v957_v7, %v957_v7  ;;  %1637 = vmatprep.subr.mxu0 %v1140_v46 }
 0x70c   :  { %1638 = vmatpush3.msra.mxu0 %v1140_v46 }
 0x70d   :  { %v958_v1 = vsub.f32 %v937_v51, %v954_v63  ;;  %v969_v3 = vsel %vm48_vm0, %v961_v0, 0.0  ;;  %1639 = vmatprep.subr.mxu0 %v1139_v47  ;;  %v1385_v51 = vld [vmem:[#allocation5 + $0x203] ss:$0 sm:$0xff] }
 0x70e   :  { %970 = vadd.xlane.f32.xlu1 %v969_v3  ;;  %1640 = vmatpush3.msra.mxu0 %v1139_v47 }
 0x70f   :  { %v962_v4 = vmul.f32 %v958_v1, %v958_v1  ;;  %1641 = vmatprep.subr.mxu0 %v1138_v48 }
 0x710   :  { %1642 = vmatpush3.msra.mxu0 %v1138_v48 }
 0x711   :  { %v972_v9 = vsel %vm48_vm0, %v962_v4, 0.0  ;;  %1643 = vmatprep.subr.mxu0 %v1137_v49 }
 0x712   :  { %973 = vadd.xlane.f32.xlu0 %v972_v9  ;;  %1644 = vmatpush3.msra.mxu0 %v1137_v49 }
 0x713   :  { %1645 = vmatprep.subr.mxu0 %v1136_v50 }
 0x714   :  { %1646 = vmatpush3.msra.mxu0 %v1136_v50 }
 0x78e   :  { %v968_v16 = vpop.xlane.xlu1 %967 }
 0x78f   :  { %v976_v17 = vmul.f32 0.03125, %v968_v16 }
 0x791   :  { %v980_v18 = vadd.f32 1e-05, %v976_v17 }
 0x792   :  { %v965_v19 = vpop.xlane.xlu1 %964 }
 0x793   :  { %1677 = vrsqrt.f32 %v980_v18  ;;  %v975_v20 = vmul.f32 0.03125, %v965_v19  ;;  %v1390_v19 = vld [vmem:[#allocation5 + $0x204] ss:$0 sm:$0xff] }
 0x795   :  { %v979_v21 = vadd.f32 1e-05, %v975_v20 }
 0x797   :  { %1679 = vrsqrt.f32 %v979_v21  ;;  %v971_v22 = vpop.xlane.xlu1 %970 }
 0x798   :  { %v977_v23 = vmul.f32 0.03125, %v971_v22 }
 0x79a   :  { %v981_v24 = vadd.f32 1e-05, %v977_v23 }
 0x79b   :  { %v974_v25 = vpop.xlane.xlu0 %973 }
 0x79c   :  { %1681 = vrsqrt.f32 %v981_v24  ;;  %v978_v26 = vmul.f32 0.03125, %v974_v25 }
 0x79e   :  { %v982_v27 = vadd.f32 1e-05, %v978_v26 }
 0x7a0   :  { %v1678_v28 = vpop.eup %1677  ;;  %1683 = vrsqrt.f32 %v982_v27 }
 0x7a1   :  { %v988_v29 = vmul.f32 %v1678_v28, %v956_v53 }
 0x7a3   :  { %v997_v33 = vmul.f32 %v1383_v30, %v988_v29 }
 0x7a4   :  { %v1680_v31 = vpop.eup %1679 }
 0x7a5   :  { %v987_v32 = vmul.f32 %v1680_v31, %v955_v57  ;;  %v1899_v38 = vadd.f32 %v1384_v35, %v997_v33 }
 0x7a7   :  { %v996_v34 = vmul.f32 %v1383_v30, %v987_v32 }
 0x7a9   :  { %v1682_v36 = vpop.eup %1681  ;;  %v1897_v37 = vadd.f32 %v1384_v35, %v996_v34 }
 0x7aa   :  { %v989_v39 = vmul.f32 %v1682_v36, %v957_v7 }
 0x7ab   :  { %1625 = vmatprep.mubr.msk.f32.mxu1 %vm48_vm0, %v1897_v37 }
 0x7ac   :  { %1626 = vmatmul.mubr.msk.f32.vlgmr.msra.gmra.mxu1 %vm48_vm0, %v1899_v38  ;;  %v998_v40 = vmul.f32 %v1383_v30, %v989_v39 }
 0x7ad   :  { %v1684_v41 = vpop.eup %1683 }
 0x7ae   :  { %v1905_v8 = vadd.f32 %v1384_v35, %v998_v40  ;;  %v990_v11 = vmul.f32 %v1684_v41, %v958_v1 }
 0x7b0   :  { %1628 = vmatprep.mubr.msk.f32.mxu1 %vm48_vm0, %v1905_v8  ;;  %v999_v10 = vmul.f32 %v1383_v30, %v990_v11 }
 0x7b2   :  { %v1909_v42 = vadd.f32 %v1384_v35, %v999_v10 }
 0x7b4   :  { %1629 = vmatmul.mubr.msk.f32.gmra.mxu1 %vm48_vm0, %v1909_v42 }
 0x86c   :  { %v1627_v5 = vpop.f32.mrf.mxu1 }
 0x86d   :  { %v1102_v52 = vadd.f32 %v1627_v5, %v1385_v51 }
 0x86e   :  { %v1096_v2 = vpop.f32.mrf.mxu1 }
 0x86f   :  { %v1121_v53 = vmul.f32 0.70710677, %v1102_v52  ;;  %v1097_v54 = vadd.f32 %v1385_v51, %v1096_v2  ;;  %v1116_v1 = vmul.f32 0.5, %v1102_v52 }
 0x871   :  { %1685 = verf.f32 %v1121_v53  ;;  %v1120_v55 = vmul.f32 0.70710677, %v1097_v54  ;;  %v1115_v63 = vmul.f32 0.5, %v1097_v54 }
 0x873   :  { %1687 = verf.f32 %v1120_v55 }
 0x874   :  { %v1630_v56 = vpop.f32.mrf.mxu1 }
 0x875   :  { %v1112_v57 = vadd.f32 %v1630_v56, %v1385_v51 }
 0x876   :  { %v1106_v58 = vpop.f32.mrf.mxu1 }
 0x877   :  { %v1123_v59 = vmul.f32 0.70710677, %v1112_v57  ;;  %v1107_v6 = vadd.f32 %v1385_v51, %v1106_v58  ;;  %v1118_v16 = vmul.f32 0.5, %v1112_v57 }
 0x879   :  { %1689 = verf.f32 %v1123_v59  ;;  %v1122_v60 = vmul.f32 0.70710677, %v1107_v6  ;;  %v1117_v14 = vmul.f32 0.5, %v1107_v6 }
 0x87b   :  { %1691 = verf.f32 %v1122_v60 }
 0x87e   :  { %v1686_v61 = vpop.eup %1685 }
 0x87f   :  { %v1129_v62 = vadd.f32 1.0, %v1686_v61 }
 0x880   :  { %v1688_v7 = vpop.eup %1687 }
 0x881   :  { %v1128_v0 = vadd.f32 1.0, %v1688_v7  ;;  %v1133_v4 = vmul.f32 %v1129_v62, %v1116_v1  ;;  %v1395_v62 = vld [vmem:[#allocation5 + $0x205] ss:$0 sm:$0xff]  ;;  %v1396_v1 = vld [vmem:[#allocation5 + $0x206] ss:$0 sm:$0xff] }
 0x883   :  { %v1132_v3 = vmul.f32 %v1128_v0, %v1115_v63 }
 0x885   :  { %1647 = vmatprep.mubr.msk.f32.mxu0 %vm581_vm1, %v1132_v3 }
 0x886   :  { %v1690_v9 = vpop.eup %1689  ;;  %1648 = vmatmul.mubr.msk.f32.vlgmr.msra.gmra.mxu0 %vm581_vm1, %v1133_v4 }
 0x887   :  { %v1131_v13 = vadd.f32 1.0, %v1690_v9 }
 0x888   :  { %v1692_v12 = vpop.eup %1691 }
 0x889   :  { %v1130_v15 = vadd.f32 1.0, %v1692_v12  ;;  %v1135_v18 = vmul.f32 %v1131_v13, %v1118_v16 }
 0x88b   :  { %v1134_v17 = vmul.f32 %v1130_v15, %v1117_v14 }
 0x88d   :  { %1650 = vmatprep.mubr.msk.f32.mxu0 %vm581_vm1, %v1134_v17 }
 0x88e   :  { %1651 = vmatmul.mubr.msk.f32.gmra.mxu0 %vm581_vm1, %v1135_v18 }
 0x946   :  { %v1649_v20 = vpop.f32.mrf.mxu0 }
 0x947   :  { %v1233_v21 = vadd.f32 %v1649_v20, %v1390_v19 }
 0x948   :  { %v1227_v22 = vpop.f32.mrf.mxu0 }
 0x949   :  { %v1228_v23 = vadd.f32 %v1390_v19, %v1227_v22  ;;  %v1247_v24 = vadd.f32 %v1233_v21, %v1899_v38 }
 0x94b   :  { %v1253_v25 = vsel %vm48_vm0, %v1247_v24, 0.0  ;;  %v1246_v26 = vadd.f32 %v1228_v23, %v1897_v37 }
 0x94c   :  { %1254 = vadd.xlane.f32.xlu0 %v1253_v25 }
 0x94d   :  { %v1250_v27 = vsel %vm48_vm0, %v1246_v26, 0.0 }
 0x94e   :  { %1251 = vadd.xlane.f32.xlu1 %v1250_v27  ;;  %v1652_v28 = vpop.f32.mrf.mxu0 }
 0x94f   :  { %v1243_v29 = vadd.f32 %v1652_v28, %v1390_v19 }
 0x950   :  { %v1237_v30 = vpop.f32.mrf.mxu0 }
 0x951   :  { %v1238_v31 = vadd.f32 %v1390_v19, %v1237_v30  ;;  %v1249_v32 = vadd.f32 %v1243_v29, %v1909_v42 }
 0x953   :  { %v1259_v33 = vsel %vm48_vm0, %v1249_v32, 0.0  ;;  %v1248_v34 = vadd.f32 %v1238_v31, %v1905_v8 }
 0x954   :  { %1260 = vadd.xlane.f32.xlu0 %v1259_v33 }
 0x955   :  { %v1256_v35 = vsel %vm48_vm0, %v1248_v34, 0.0 }
 0x956   :  { %1257 = vadd.xlane.f32.xlu1 %v1256_v35 }
 0x9d5   :  { %v1255_v36 = vpop.xlane.xlu0 %1254 }
 0x9d6   :  { %v1263_v37 = vmul.f32 0.03125, %v1255_v36 }
 0x9d7   :  { %v1252_v38 = vpop.xlane.xlu1 %1251 }
 0x9d8   :  { %v1267_v39 = vsub.f32 %v1247_v24, %v1263_v37  ;;  %v1262_v40 = vmul.f32 0.03125, %v1252_v38 }
 0x9da   :  { %v1266_v41 = vsub.f32 %v1246_v26, %v1262_v40  ;;  %v1271_v11 = vmul.f32 %v1267_v39, %v1267_v39 }
 0x9dc   :  { %v1277_v10 = vsel %vm48_vm0, %v1271_v11, 0.0  ;;  %v1270_v43 = vmul.f32 %v1266_v41, %v1266_v41 }
 0x9dd   :  { %1278 = vadd.xlane.f32.xlu0 %v1277_v10  ;;  %v1261_v42 = vpop.xlane.xlu0 %1260 }
 0x9de   :  { %v1265_v44 = vmul.f32 0.03125, %v1261_v42  ;;  %v1274_v45 = vsel %vm48_vm0, %v1270_v43, 0.0 }
 0x9df   :  { %1275 = vadd.xlane.f32.xlu1 %v1274_v45  ;;  %v1258_v8 = vpop.xlane.xlu1 %1257 }
 0x9e0   :  { %v1269_v46 = vsub.f32 %v1249_v32, %v1265_v44  ;;  %v1264_v47 = vmul.f32 0.03125, %v1258_v8 }
 0x9e2   :  { %v1268_v48 = vsub.f32 %v1248_v34, %v1264_v47  ;;  %v1273_v49 = vmul.f32 %v1269_v46, %v1269_v46 }
 0x9e4   :  { %v1283_v50 = vsel %vm48_vm0, %v1273_v49, 0.0  ;;  %v1272_v51 = vmul.f32 %v1268_v48, %v1268_v48 }
 0x9e5   :  { %1284 = vadd.xlane.f32.xlu0 %v1283_v50 }
 0x9e6   :  { %v1280_v5 = vsel %vm48_vm0, %v1272_v51, 0.0 }
 0x9e7   :  { %1281 = vadd.xlane.f32.xlu1 %v1280_v5 }
 0xa66   :  { %v1279_v52 = vpop.xlane.xlu0 %1278 }
 0xa67   :  { %v1287_v2 = vmul.f32 0.03125, %v1279_v52 }
 0xa68   :  { %v1276_v53 = vpop.xlane.xlu1 %1275 }
 0xa69   :  { %v1291_v54 = vadd.f32 1e-05, %v1287_v2  ;;  %v1286_v55 = vmul.f32 0.03125, %v1276_v53 }
 0xa6b   :  { %1693 = vrsqrt.f32 %v1291_v54  ;;  %v1290_v56 = vadd.f32 1e-05, %v1286_v55 }
 0xa6d   :  { %1695 = vrsqrt.f32 %v1290_v56 }
 0xa6e   :  { %v1285_v57 = vpop.xlane.xlu0 %1284 }
 0xa6f   :  { %v1289_v58 = vmul.f32 0.03125, %v1285_v57 }
 0xa70   :  { %v1282_v59 = vpop.xlane.xlu1 %1281 }
 0xa71   :  { %v1293_v6 = vadd.f32 1e-05, %v1289_v58  ;;  %v1288_v60 = vmul.f32 0.03125, %v1282_v59 }
 0xa73   :  { %1697 = vrsqrt.f32 %v1293_v6  ;;  %v1292_v61 = vadd.f32 1e-05, %v1288_v60 }
 0xa75   :  { %1699 = vrsqrt.f32 %v1292_v61 }
 0xa78   :  { %v1694_v7 = vpop.eup %1693 }
 0xa79   :  { %v1299_v63 = vmul.f32 %v1694_v7, %v1267_v39 }
 0xa7a   :  { %v1696_v0 = vpop.eup %1695 }
 0xa7b   :  { %v1298_v3 = vmul.f32 %v1696_v0, %v1266_v41  ;;  %v1308_v4 = vmul.f32 %v1395_v62, %v1299_v63 }
 0xa7d   :  { %v1307_v9 = vmul.f32 %v1395_v62, %v1298_v3  ;;  %v1317_v12 = vadd.f32 %v1396_v1, %v1308_v4 }
 0xa7f   :  { %v1316_v13 = vadd.f32 %v1396_v1, %v1307_v9  ;;  %1321 = vst.msk [vmem:[#allocation7 + $0x8] sm:$0xff] %vm48_vm0, %v1317_v12 }
 0xa80   :  { %v1698_v14 = vpop.eup %1697 }
 0xa81   :  { %v1301_v15 = vmul.f32 %v1698_v14, %v1269_v46  ;;  %1320 = vst.msk [vmem:[#allocation7] sm:$0xff] %vm48_vm0, %v1316_v13 }
 0xa82   :  { %v1700_v16 = vpop.eup %1699 }
 0xa83   :  { %v1300_v17 = vmul.f32 %v1700_v16, %v1268_v48  ;;  %v1310_v18 = vmul.f32 %v1395_v62, %v1301_v15 }
 0xa85   :  { %v1309_v19 = vmul.f32 %v1395_v62, %v1300_v17  ;;  %v1319_v20 = vadd.f32 %v1396_v1, %v1310_v18 }
 0xa87   :  { %v1318_v21 = vadd.f32 %v1396_v1, %v1309_v19  ;;  %1323 = vst.msk [vmem:[#allocation7 + $0x18] sm:$0xff] %vm48_vm0, %v1319_v20 }
 0xa89   :  { %1322 = vst.msk [vmem:[#allocation7 + $0x10] sm:$0xff] %vm48_vm0, %v1318_v21 }
 0xa8a   :  { %1752 = shalt.err (!%p1749_p0)
}
 0xa8b   :  { %1335 = dma.vmem_to_hbm [thread:$0]  %s1330_s22, 512, %s1941_s2, [#allocation4], %s1768_s12, %s1768_s12, %s1769_s13  }
 0xa8c   :  { %1765 = dma.done.wait [#allocation4], 512  }
 0xa8d   :  { %1766 = vsyncadd [#allocation4], 4294966784 }
 0xa8e   :  { %1339 = vsyncpa [#allocation3], 1 }
 0xa8f   :  { %1340 = vsyncpa [#allocation6], 1 }
 0xa90   :  { %1341 = vsyncpa [#allocation4], 1 }

</bundles_post_ra>
